<compile_context>
chip_gen: v5e
topology: v5e:2x2
jax: 0.10.0
libtpu: 0.0.40
codegen_flags: <defaults>
</compile_context>

<pallas_src>
import jax
import jax.numpy as jnp
from jax.experimental import pallas as pl
from jax.experimental.pallas import tpu as pltpu


def _mcpitts_kernel(thr_ref, x_ref, o_ref):
    """Hard step about the threshold: 1 above, 0 below, 0.5 exactly at."""
    x = x_ref[...]
    t = thr_ref[0]
    if jnp.issubdtype(x.dtype, jnp.floating) and x.dtype != jnp.float32:
        # Compare in the input's native width (bf16 VALU on v6e/v7x); matches
        # the reference, which forms (x - thr) in the input dtype.
        t = t.astype(x.dtype)
    out_dt = o_ref.dtype
    one = jnp.asarray(1.0, out_dt)
    zero = jnp.asarray(0.0, out_dt)
    half = jnp.asarray(0.5, out_dt)
    # Equivalent to 0.5 * (sign(x - thr) + 1) for finite inputs.
    o_ref[...] = jnp.where(x > t, one, jnp.where(x < t, zero, half))


def _round_up(v, m):
    return ((v + m - 1) // m) * m


def mcpitts_forward(x, thr, beta=3):
    """McPitts forward.  `beta` only affects the backward pass in the
    reference module, so it is unused here (kept for signature parity)."""
    del beta  # backward-only (surrogate gradient) in the reference module

    orig_shape = x.shape
    in_dtype = x.dtype
    # Reference returns floats; keep float inputs at native width (0, 0.5, 1
    # are exactly representable in bf16/f32), promote ints to f32.
    out_dtype = in_dtype if jnp.issubdtype(in_dtype, jnp.floating) else jnp.float32

    total = int(x.size)
    if total == 0:
        return jnp.zeros(orig_shape, out_dtype)

    flat = jnp.ravel(x)
    thr_arr = jnp.asarray(thr, jnp.float32).reshape((1,))

    # Widest lane count that divides the element count -> no padding needed.
    lane = None
    for cand in (1024, 512, 256, 128):
        if total % cand == 0:
            lane = cand
            break
    if lane is None:
        # Rare ragged fallback (element count not a multiple of 128).
        # TODO(synk): handle the tail with a masked store / second tiny call
        # instead of a padded copy; only hit for odd sizes.
        lane = 128
        padded = pl.cdiv(total, lane) * lane
        flat = jnp.pad(flat, (0, padded - total))
    else:
        padded = total
    rows = padded // lane
    x2d = flat.reshape(rows, lane)

    # Dtype-aware block sizing: ~8 MiB of (in + out) bytes per block, so the
    # double-buffered pipeline footprint is ~16 MiB on every generation.
    in_b = jnp.dtype(in_dtype).itemsize
    out_b = jnp.dtype(out_dtype).itemsize
    per_row_bytes = lane * (in_b + out_b)
    row_align = 8 * max(1, 4 // min(in_b, out_b))  # 8 f32 / 16 bf16 / 32 int8
    target_block_bytes = 8 * 1024 * 1024
    max_block_rows = max(
        row_align, (target_block_bytes // per_row_bytes) // row_align * row_align)

    if rows <= row_align:
        block_rows = rows  # tiny input: single full-extent block (always legal)
    else:
        # >= ~4 grid steps so in/out DMAs overlap and both v7x TCs stream.
        block_rows = min(max_block_rows,
                         max(row_align, _round_up(pl.cdiv(rows, 4), row_align)))
        if block_rows >= rows:
            block_rows = rows
    grid = (pl.cdiv(rows, block_rows),)

    out2d = pl.pallas_call(
        _mcpitts_kernel,
        out_shape=jax.ShapeDtypeStruct((rows, lane), out_dtype),
        grid_spec=pltpu.PrefetchScalarGridSpec(
            num_scalar_prefetch=0,
            grid=grid,
            in_specs=[
                pl.BlockSpec(memory_space=pltpu.MemorySpace.SMEM),  # thr scalar
                pl.BlockSpec((block_rows, lane), lambda i: (i, 0)),
            ],
            out_specs=pl.BlockSpec((block_rows, lane), lambda i: (i, 0)),
        ),
        compiler_params=pltpu.CompilerParams(
            dimension_semantics=("parallel",),
            vmem_limit_bytes=32 * 1024 * 1024,
        ),
    )(thr_arr, x2d)

    out_flat = out2d.reshape(-1)
    if padded != total:
        out_flat = out_flat[:total]
    return out_flat.reshape(orig_shape)


if __name__ == "__main__":
    key = jax.random.PRNGKey(0)
    # small NCHW-like input consistent with a spiking-layer activation map
    x = jax.random.normal(key, (2, 4, 16, 16), dtype=jnp.float32)

    thr = 0.5
    beta = 3

    y = mcpitts_forward(x, thr, beta)
    y = jax.block_until_ready(y)

    # reference check in plain JAX
    y_ref = 0.5 * (jnp.sign(x - thr) + 1.0)
    assert y.shape == x.shape and y.dtype == x.dtype
    assert jnp.allclose(y, y_ref), "mismatch vs reference"

    print("KERNEL_OK")
</pallas_src>

<mosaic_0001>
module attributes {stable_mosaic.version = 11 : i64} {
  func.func @_mcpitts_kernel(%arg0: i32, %arg1: memref<1xf32, #tpu.memory_space<smem>>, %arg2: memref<2x1024xf32, #tpu.memory_space<vmem>>, %arg3: memref<2x1024xf32, #tpu.memory_space<vmem>>) attributes {dimension_semantics = [#tpu.dimension_semantics<parallel>], iteration_bounds = array<i64: 1>, scalar_prefetch = 0 : i64, scratch_operands = 0 : i64, tpu.core_type = #tpu.core_type<tc>, window_params = [{transform_indices = @transform_0, window_bounds = array<i64: 1>}, {transform_indices = @transform_1, window_bounds = array<i64: 2, 1024>}, {transform_indices = @transform_2, window_bounds = array<i64: 2, 1024>}]} {
    %c0 = arith.constant 0 : index
    %c0_0 = arith.constant 0 : index
    %0 = vector.load %arg2[%c0, %c0_0] : memref<2x1024xf32, #tpu.memory_space<vmem>>, vector<2x1024xf32>
    %c0_1 = arith.constant 0 : index
    %1 = memref.load %arg1[%c0_1] : memref<1xf32, #tpu.memory_space<smem>>
    %2 = vector.broadcast %1 : f32 to vector<2x1024xf32>
    %3 = arith.cmpf ogt, %0, %2 : vector<2x1024xf32>
    %4 = vector.broadcast %1 : f32 to vector<2x1024xf32>
    %5 = arith.cmpf olt, %0, %4 : vector<2x1024xf32>
    %cst = arith.constant 0.000000e+00 : f32
    %cst_2 = arith.constant 5.000000e-01 : f32
    %6 = vector.broadcast %cst : f32 to vector<2x1024xf32>
    %7 = vector.broadcast %cst_2 : f32 to vector<2x1024xf32>
    %8 = arith.select %5, %6, %7 : vector<2x1024xi1>, vector<2x1024xf32>
    %cst_3 = arith.constant 1.000000e+00 : f32
    %9 = vector.broadcast %cst_3 : f32 to vector<2x1024xf32>
    %10 = arith.select %3, %9, %8 : vector<2x1024xi1>, vector<2x1024xf32>
    %c0_4 = arith.constant 0 : index
    %c0_5 = arith.constant 0 : index
    %11 = vector.load %arg3[%c0_4, %c0_5] : memref<2x1024xf32, #tpu.memory_space<vmem>>, vector<2x1024xf32>
    tpu.vector_store %arg3[%c0_4, %c0_5], %10 {strides = array<i32>} : memref<2x1024xf32, #tpu.memory_space<vmem>>, vector<2x1024xf32>,
    return
  }
  func.func @transform_0(%arg0: i32) -> i32 {
    %c0_i32 = arith.constant 0 : i32
    %c0_i32_0 = arith.constant 0 : i32
    return %c0_i32 : i32
  }
  func.func @transform_1(%arg0: i32) -> (i32, i32) {
    %c0_i32 = arith.constant 0 : i32
    %c0_i32_0 = arith.constant 0 : i32
    return %arg0, %c0_i32 : i32, i32
  }
  func.func @transform_2(%arg0: i32) -> (i32, i32) {
    %c0_i32 = arith.constant 0 : i32
    %c0_i32_0 = arith.constant 0 : i32
    return %arg0, %c0_i32 : i32, i32
  }
}

</mosaic_0001>

<bundles_post_ra>
// kernel: tpu_custom_call.1
= control target key start
LH: loop header
LB: loop body
LE: loop exit
PB: predicated region body
PF: predicated region fallthrough
CT: control target
= control target key end

     0   :  { %8 = vsyncpa [#allocation4], 0  ;;  %s140_s0 = inlined_call_operand.<no memory space> [shape: f32[1], index: 0, kind: input, shape index: {}]   ;;  %s141_s1 = inlined_call_operand.hbm [shape: f32[2,1024], index: 1, kind: input, shape index: {}]   ;;  %s142_s2 = inlined_call_operand.hbm [shape: f32[2,1024], index: 2, kind: output, shape index: {}]  }
   0x1   :  { %9 = vsyncpa [#allocation5], 0  ;;  %s17_s11 = sshll.u32 %s141_s1, 4  ;;  %s113_s12 = smov [#allocation3]   ;;  %s18_s11 = int_to_ptr.hbm [resolvable:$true] %s17_s11 }
   0x2   :  { %s19_s13 = sshll.u32 %s113_s12, 4  ;;  %s20_s13 = int_to_ptr.vmem [resolvable:$true] %s19_s13 }
   0x3   :  { %22 = dma.hbm_to_vmem [thread:$0]  %s18_s11, 256, %s20_s13, [#allocation4]  }
   0x4   :  { %109 = dma.done.wait [#allocation4], 256  }
   0x5   :  { %110 = vsyncadd [#allocation4], 4294967040  ;;  %v30_v0 = vstv %s140_s0  ;;  %v27_v1 = vld [vmem:[#allocation3] sm:$0xff]  ;;  %v28_v2 = vld [vmem:[#allocation3 + $0x8] sm:$0xff]  ;;  %s114_s16 = smov [#allocation6]   ;;  %s48_s20 = sshll.u32 %s142_s2, 4  ;;  %s49_s20 = int_to_ptr.hbm [resolvable:$true] %s48_s20 }
   0x6   :  { %s46_s17 = sshll.u32 %s114_s16, 4  ;;  %vm31_vm0 = vcmp.gt.f32.partialorder %v27_v1, %v30_v0  ;;  %vm33_vm1 = vcmp.lt.f32.partialorder %v27_v1, %v30_v0  ;;  %vm32_vm2 = vcmp.gt.f32.partialorder %v28_v2, %v30_v0  ;;  %vm34_vm3 = vcmp.lt.f32.partialorder %v28_v2, %v30_v0  ;;  %s47_s17 = int_to_ptr.vmem [resolvable:$true] %s46_s17 }
   0x7   :  { %v115_v3 = vmov 0.5  }
   0x8   :  { %v35_v4 = vsel %vm33_vm1, 0.0, %v115_v3  ;;  %v36_v5 = vsel %vm34_vm3, 0.0, %v115_v3 }
   0x9   :  { %v37_v6 = vsel %vm31_vm0, 1.0, %v35_v4  ;;  %v38_v7 = vsel %vm32_vm2, 1.0, %v36_v5 }
   0xa   :  { %39 = vst [vmem:[#allocation6] sm:$0xff] %v37_v6 }
   0xb   :  { %40 = vst [vmem:[#allocation6 + $0x8] sm:$0xff] %v38_v7 }
   0xc   :  { %51 = dma.vmem_to_hbm [thread:$0]  %s47_s17, 256, %s49_s20, [#allocation5]  }
   0xd   :  { %111 = dma.done.wait [#allocation5], 256  }
   0xe   :  { %112 = vsyncadd [#allocation5], 4294967040 }
   0xf   :  { %56 = vsyncpa [#allocation4], 1 }
  0x10   :  { %57 = vsyncpa [#allocation5], 1 }

</bundles_post_ra>
